<compile_context>
chip_gen: v5e
topology: v5e:2x2
jax: 0.10.0
libtpu: 0.0.40
codegen_flags: <defaults>
</compile_context>

<pallas_src>
import functools

import numpy as np

import jax
import jax.numpy as jnp
from jax.experimental import pallas as pl
from jax.experimental.pallas import tpu as pltpu


_LOG_CLAMP = -100.0


# ----------------------------- in-kernel math --------------------------------


def _bce_elem(x, y):
    """Per-element torch.nn.BCELoss term, computed in f32."""
    x = x.astype(jnp.float32)
    y = y.astype(jnp.float32)
    log_x = jnp.maximum(jnp.log(x), _LOG_CLAMP)
    log_1mx = jnp.maximum(jnp.log(1.0 - x), _LOG_CLAMP)
    return -(y * log_x + (1.0 - y) * log_1mx)


def _bce_elem_const(x, label):
    """BCE term for a compile-time constant 0/1 label (half the log count)."""
    x = x.astype(jnp.float32)
    if label == 1.0:
        return -jnp.maximum(jnp.log(x), _LOG_CLAMP)
    return -jnp.maximum(jnp.log(1.0 - x), _LOG_CLAMP)


def _mask_ragged_rows(per_elem, rows, tile_m):
    """Zero rows past `rows` with a broadcast-shaped (tile_m, 1) mask."""
    i = pl.program_id(0)
    r = jax.lax.broadcasted_iota(jnp.int32, (tile_m, 1), 0) + i * tile_m
    return jnp.where(r < rows, per_elem, 0.0)


# ----------------------------- kernels ----------------------------------------


def _bce4_kernel(ro_ref, fo_ref, rl_ref, fl_ref, out_ref, *,
                 rows, tile_m, mask_rows):
    """General path: four tensor streams (outputs + labels)."""
    per_elem = (_bce_elem(ro_ref[...], rl_ref[...]) +
                _bce_elem(fo_ref[...], fl_ref[...]))
    if mask_rows:
        per_elem = _mask_ragged_rows(per_elem, rows, tile_m)
    out_ref[...] = jnp.sum(per_elem, axis=0, keepdims=True).reshape(out_ref.shape)


def _bce2_kernel(ro_ref, fo_ref, out_ref, *,
                 rows, tile_m, mask_rows, real_label, fake_label):
    """Constant-label fast path: two tensor streams, labels baked in."""
    per_elem = (_bce_elem_const(ro_ref[...], real_label) +
                _bce_elem_const(fo_ref[...], fake_label))
    if mask_rows:
        per_elem = _mask_ragged_rows(per_elem, rows, tile_m)
    out_ref[...] = jnp.sum(per_elem, axis=0, keepdims=True).reshape(out_ref.shape)


# ----------------------------- wrapper helpers --------------------------------


def _round_up(x, m):
    return ((x + m - 1) // m) * m


def _round_down(x, m):
    return (x // m) * m


def _pick_lane_width(total):
    """Lane-dense column width: 1024, else largest multiple of 128 <= total."""
    if total >= 1024:
        return 1024
    if total >= 128:
        return _round_down(total, 128)
    return total  # tiny input: whole array is one (1, total) block


def _vmem_limit_bytes():
    try:
        cap = int(pltpu.get_tpu_info().vmem_capacity_bytes)
    except Exception:
        cap = 64 * 1024 * 1024  # v7x-safe fallback
    # Scoped limit: 3/4 of physical, capped at 64 MiB (plenty for this kernel).
    return min((cap * 3) // 4, 64 * 1024 * 1024)


def _bulk_partial_sum(kernel, inputs, rows, lane, logs_per_elem):
    """Run the Pallas kernel over the lane-dense (rows, lane) bulk; return f32 sum."""
    itemsizes = [int(np.dtype(x.dtype).itemsize) for x in inputs]
    granule = 8 if min(itemsizes) >= 4 else 16       # sublane granularity
    max_item = max(itemsizes)
    n_streams = len(inputs)

    vmem_limit = _vmem_limit_bytes()
    # Double-buffered input blocks stay at roughly 1/3 of the scoped limit,
    # leaving headroom for kernel-internal f32 temporaries.
    per_input_bytes = vmem_limit // (6 * n_streams)
    max_rows = max(granule,
                   _round_down(per_input_bytes // max(lane * max_item, 1), granule))

    if rows <= max_rows:
        if rows >= 2 * granule:
            # Split into two row blocks so the "parallel" axis can shard across
            # both v7x TensorCores (no-op on single-TC v5e/v6e).
            tile_m = _round_up(-(-rows // 2), granule)
        else:
            tile_m = rows                      # block dim == full dim (allowed)
    else:
        tile_m = max_rows
    grid_m = -(-rows // tile_m)
    mask_rows = (rows % tile_m) != 0

    kern = functools.partial(kernel, rows=rows, tile_m=tile_m, mask_rows=mask_rows)

    in_spec = pl.BlockSpec((tile_m, lane), lambda i: (i, 0))
    # Lane-dense (1, 1, lane) output block per row block; last two dims equal the
    # full output dims, so stores are unmasked full-lane vst.
    out_spec = pl.BlockSpec((1, 1, lane), lambda i: (i, 0, 0))

    n_elems = rows * lane
    bytes_accessed = sum(int(x.size) * s for x, s in zip(inputs, itemsizes))
    bytes_accessed += grid_m * lane * 4

    partials = pl.pallas_call(
        kern,
        out_shape=jax.ShapeDtypeStruct((grid_m, 1, lane), jnp.float32),
        grid_spec=pltpu.PrefetchScalarGridSpec(
            num_scalar_prefetch=0,
            grid=(grid_m,),
            in_specs=[in_spec] * n_streams,
            out_specs=out_spec,
        ),
        compiler_params=pltpu.CompilerParams(
            dimension_semantics=("parallel",),
            vmem_limit_bytes=int(vmem_limit),
        ),
        cost_estimate=pl.CostEstimate(
            flops=10 * n_elems,
            transcendentals=logs_per_elem * n_elems,
            bytes_accessed=int(bytes_accessed),
        ),
    )(*inputs)
    return jnp.sum(partials)


def _maybe_constant_label(x):
    """Return 0.0 / 1.0 if x is a concrete tensor filled with exactly that value."""
    try:
        arr = np.asarray(x, dtype=np.float32)
    except Exception:          # tracer under jit / abstract value -> general path
        return None
    if arr.size == 0:
        return None
    v = float(arr.flat[0])
    if v not in (0.0, 1.0):
        return None
    return v if bool(np.all(arr == v)) else None


# ----------------------------- public wrapper ---------------------------------


def combined_loss(real_output, fake_output, real_labels, fake_labels,
                  *, detect_constant_labels=True):
    """Pallas TPU implementation of CombinedLoss.forward. Returns a scalar f32."""
    assert (real_output.shape == fake_output.shape ==
            real_labels.shape == fake_labels.shape)

    ro = jnp.ravel(jnp.asarray(real_output))
    fo = jnp.ravel(jnp.asarray(fake_output))
    rl = jnp.ravel(jnp.asarray(real_labels))
    fl = jnp.ravel(jnp.asarray(fake_labels))

    total = int(ro.shape[0])
    if total == 0:
        return jnp.asarray(jnp.nan, jnp.float32)   # torch mean-of-empty is nan

    lane = _pick_lane_width(total)
    rows = total // lane
    bulk = rows * lane
    tail = total - bulk

    # Constant-label fast path (exact all-ones / all-zeros label tensors only,
    # so label smoothing etc. falls back to the general 4-stream path).
    real_c = fake_c = None
    if detect_constant_labels:
        real_c = _maybe_constant_label(real_labels)
        fake_c = _maybe_constant_label(fake_labels)
    fast = (real_c is not None) and (fake_c is not None)

    # ----- bulk: lane-dense (rows, lane) view, summed by the Pallas kernel -----
    if fast:
        kernel = functools.partial(_bce2_kernel, real_label=real_c, fake_label=fake_c)
        inputs = (ro[:bulk].reshape(rows, lane),
                  fo[:bulk].reshape(rows, lane))
        logs_per_elem = 2
    else:
        kernel = _bce4_kernel
        inputs = (ro[:bulk].reshape(rows, lane),
                  fo[:bulk].reshape(rows, lane),
                  rl[:bulk].reshape(rows, lane),
                  fl[:bulk].reshape(rows, lane))
        logs_per_elem = 4
    loss_sum = _bulk_partial_sum(kernel, inputs, rows, lane, logs_per_elem)

    # ----- ragged tail (< lane elements): tiny, handled with plain jnp -----
    if tail > 0:
        if fast:
            tail_sum = (jnp.sum(_bce_elem_const(ro[bulk:], real_c)) +
                        jnp.sum(_bce_elem_const(fo[bulk:], fake_c)))
        else:
            tail_sum = (jnp.sum(_bce_elem(ro[bulk:], rl[bulk:])) +
                        jnp.sum(_bce_elem(fo[bulk:], fl[bulk:])))
        loss_sum = loss_sum + tail_sum

    # (mean_real + mean_fake) / 2 == (sum_real + sum_fake) / (2 * numel)
    # NOTE: f32 partial-sum reduction order differs slightly from torch's mean;
    # expect tiny fp drift for very large tensors.
    return loss_sum / jnp.float32(2.0 * total)


# ----------------------------- reference & test --------------------------------


def _reference_combined_loss(real_output, fake_output, real_labels, fake_labels):
    def bce_mean(x, y):
        x = x.astype(jnp.float32)
        y = y.astype(jnp.float32)
        log_x = jnp.maximum(jnp.log(x), _LOG_CLAMP)
        log_1mx = jnp.maximum(jnp.log(1.0 - x), _LOG_CLAMP)
        return jnp.mean(-(y * log_x + (1.0 - y) * log_1mx))
    return (bce_mean(real_output, real_labels) +
            bce_mean(fake_output, fake_labels)) / 2.0


if __name__ == "__main__":
    key = jax.random.PRNGKey(0)

    # (a) PatchGAN-style discriminator map (batch=2, 1 channel, 30x30 patches):
    #     exercises the lane-dense bulk + ragged jnp tail.
    # (b) batch=7, 100x100: exercises multi-row tiling, the two-way row-block
    #     split ("parallel" axis / megacore), the ragged-row mask, and the tail.
    for shape in [(2, 1, 30, 30), (7, 1, 100, 100)]:
        key, k1, k2 = jax.random.split(key, 3)
        real_output = jax.nn.sigmoid(jax.random.normal(k1, shape, dtype=jnp.float32))
        fake_output = jax.nn.sigmoid(jax.random.normal(k2, shape, dtype=jnp.float32))
        real_labels = jnp.ones(shape, dtype=jnp.float32)
        fake_labels = jnp.zeros(shape, dtype=jnp.float32)

        ref = _reference_combined_loss(real_output, fake_output,
                                       real_labels, fake_labels)

        # General path (4 tensor streams).
        loss_general = jax.block_until_ready(
            combined_loss(real_output, fake_output, real_labels, fake_labels,
                          detect_constant_labels=False))
        assert jnp.isfinite(loss_general), "general-path loss is not finite"
        assert jnp.allclose(loss_general, ref, rtol=1e-5, atol=1e-6), (
            shape, loss_general, ref)

        # Constant-label fast path (auto-detected ones/zeros labels).
        loss_fast = jax.block_until_ready(
            combined_loss(real_output, fake_output, real_labels, fake_labels))
        assert jnp.isfinite(loss_fast), "fast-path loss is not finite"
        assert jnp.allclose(loss_fast, ref, rtol=1e-5, atol=1e-6), (
            shape, loss_fast, ref)

    print("KERNEL_OK")
</pallas_src>

<mosaic_0001>
module attributes {stable_mosaic.version = 11 : i64} {
  func.func @_bce4_kernel(%arg0: i32, %arg1: memref<1x1024xf32, #tpu.memory_space<vmem>>, %arg2: memref<1x1024xf32, #tpu.memory_space<vmem>>, %arg3: memref<1x1024xf32, #tpu.memory_space<vmem>>, %arg4: memref<1x1024xf32, #tpu.memory_space<vmem>>, %arg5: memref<1x1x1024xf32, #tpu.memory_space<vmem>>) attributes {dimension_semantics = [#tpu.dimension_semantics<parallel>], iteration_bounds = array<i64: 1>, scalar_prefetch = 0 : i64, scratch_operands = 0 : i64, tpu.core_type = #tpu.core_type<tc>, window_params = [{transform_indices = @transform_0, window_bounds = array<i64: 1, 1024>}, {transform_indices = @transform_1, window_bounds = array<i64: 1, 1024>}, {transform_indices = @transform_2, window_bounds = array<i64: 1, 1024>}, {transform_indices = @transform_3, window_bounds = array<i64: 1, 1024>}, {transform_indices = @transform_4, window_bounds = array<i64: 1, 1, 1024>}]} {
    %c0 = arith.constant 0 : index
    %c0_0 = arith.constant 0 : index
    %0 = vector.load %arg1[%c0, %c0_0] : memref<1x1024xf32, #tpu.memory_space<vmem>>, vector<1x1024xf32>
    %c0_1 = arith.constant 0 : index
    %c0_2 = arith.constant 0 : index
    %1 = vector.load %arg3[%c0_1, %c0_2] : memref<1x1024xf32, #tpu.memory_space<vmem>>, vector<1x1024xf32>
    %2 = math.log %0 : vector<1x1024xf32>
    %cst = arith.constant -1.000000e+02 : f32
    %3 = vector.broadcast %cst : f32 to vector<1x1024xf32>
    %4 = arith.maximumf %2, %3 : vector<1x1024xf32>
    %cst_3 = arith.constant 1.000000e+00 : f32
    %5 = vector.broadcast %cst_3 : f32 to vector<1x1024xf32>
    %6 = arith.subf %5, %0 : vector<1x1024xf32>
    %7 = math.log %6 : vector<1x1024xf32>
    %cst_4 = arith.constant -1.000000e+02 : f32
    %8 = vector.broadcast %cst_4 : f32 to vector<1x1024xf32>
    %9 = arith.maximumf %7, %8 : vector<1x1024xf32>
    %10 = arith.mulf %1, %4 : vector<1x1024xf32>
    %cst_5 = arith.constant 1.000000e+00 : f32
    %11 = vector.broadcast %cst_5 : f32 to vector<1x1024xf32>
    %12 = arith.subf %11, %1 : vector<1x1024xf32>
    %13 = arith.mulf %12, %9 : vector<1x1024xf32>
    %14 = arith.addf %10, %13 : vector<1x1024xf32>
    %cst_6 = arith.constant 0.000000e+00 : f32
    %15 = vector.broadcast %cst_6 : f32 to vector<1x1024xf32>
    %16 = arith.subf %15, %14 : vector<1x1024xf32>
    %c0_7 = arith.constant 0 : index
    %c0_8 = arith.constant 0 : index
    %17 = vector.load %arg2[%c0_7, %c0_8] : memref<1x1024xf32, #tpu.memory_space<vmem>>, vector<1x1024xf32>
    %c0_9 = arith.constant 0 : index
    %c0_10 = arith.constant 0 : index
    %18 = vector.load %arg4[%c0_9, %c0_10] : memref<1x1024xf32, #tpu.memory_space<vmem>>, vector<1x1024xf32>
    %19 = math.log %17 : vector<1x1024xf32>
    %cst_11 = arith.constant -1.000000e+02 : f32
    %20 = vector.broadcast %cst_11 : f32 to vector<1x1024xf32>
    %21 = arith.maximumf %19, %20 : vector<1x1024xf32>
    %cst_12 = arith.constant 1.000000e+00 : f32
    %22 = vector.broadcast %cst_12 : f32 to vector<1x1024xf32>
    %23 = arith.subf %22, %17 : vector<1x1024xf32>
    %24 = math.log %23 : vector<1x1024xf32>
    %cst_13 = arith.constant -1.000000e+02 : f32
    %25 = vector.broadcast %cst_13 : f32 to vector<1x1024xf32>
    %26 = arith.maximumf %24, %25 : vector<1x1024xf32>
    %27 = arith.mulf %18, %21 : vector<1x1024xf32>
    %cst_14 = arith.constant 1.000000e+00 : f32
    %28 = vector.broadcast %cst_14 : f32 to vector<1x1024xf32>
    %29 = arith.subf %28, %18 : vector<1x1024xf32>
    %30 = arith.mulf %29, %26 : vector<1x1024xf32>
    %31 = arith.addf %27, %30 : vector<1x1024xf32>
    %cst_15 = arith.constant 0.000000e+00 : f32
    %32 = vector.broadcast %cst_15 : f32 to vector<1x1024xf32>
    %33 = arith.subf %32, %31 : vector<1x1024xf32>
    %34 = arith.addf %16, %33 : vector<1x1024xf32>
    %cst_16 = arith.constant dense<0.000000e+00> : vector<1024xf32>
    %35 = vector.multi_reduction <add>, %34, %cst_16 [0] : vector<1x1024xf32> to vector<1024xf32>
    %36 = vector.shape_cast %35 : vector<1024xf32> to vector<1x1024xf32>
    %37 = vector.shape_cast %36 : vector<1x1024xf32> to vector<1x1x1024xf32>
    %c0_17 = arith.constant 0 : index
    %c0_18 = arith.constant 0 : index
    %c0_19 = arith.constant 0 : index
    %38 = vector.load %arg5[%c0_17, %c0_18, %c0_19] : memref<1x1x1024xf32, #tpu.memory_space<vmem>>, vector<1x1x1024xf32>
    tpu.vector_store %arg5[%c0_17, %c0_18, %c0_19], %37 {strides = array<i32>} : memref<1x1x1024xf32, #tpu.memory_space<vmem>>, vector<1x1x1024xf32>,
    return
  }
  func.func @transform_0(%arg0: i32) -> (i32, i32) {
    %c0_i32 = arith.constant 0 : i32
    %c0_i32_0 = arith.constant 0 : i32
    return %arg0, %c0_i32 : i32, i32
  }
  func.func @transform_1(%arg0: i32) -> (i32, i32) {
    %c0_i32 = arith.constant 0 : i32
    %c0_i32_0 = arith.constant 0 : i32
    return %arg0, %c0_i32 : i32, i32
  }
  func.func @transform_2(%arg0: i32) -> (i32, i32) {
    %c0_i32 = arith.constant 0 : i32
    %c0_i32_0 = arith.constant 0 : i32
    return %arg0, %c0_i32 : i32, i32
  }
  func.func @transform_3(%arg0: i32) -> (i32, i32) {
    %c0_i32 = arith.constant 0 : i32
    %c0_i32_0 = arith.constant 0 : i32
    return %arg0, %c0_i32 : i32, i32
  }
  func.func @transform_4(%arg0: i32) -> (i32, i32, i32) {
    %c0_i32 = arith.constant 0 : i32
    %c0_i32_0 = arith.constant 0 : i32
    %c0_i32_1 = arith.constant 0 : i32
    return %arg0, %c0_i32, %c0_i32_0 : i32, i32, i32
  }
}

</mosaic_0001>

<bundles_post_ra>
// kernel: tpu_custom_call.1
= control target key start
LH: loop header
LB: loop body
LE: loop exit
PB: predicated region body
PF: predicated region fallthrough
CT: control target
= control target key end

     0   :  { %9 = vsyncpa [#allocation3], 0  ;;  %s309_s0 = inlined_call_operand.hbm [shape: f32[1,1024], index: 0, kind: input, shape index: {}]   ;;  %s310_s1 = inlined_call_operand.hbm [shape: f32[1,1024], index: 1, kind: input, shape index: {}]   ;;  %s311_s2 = inlined_call_operand.hbm [shape: f32[1,1024], index: 2, kind: input, shape index: {}]   ;;  %s312_s3 = inlined_call_operand.hbm [shape: f32[1,1024], index: 3, kind: input, shape index: {}]   ;;  %s313_s4 = inlined_call_operand.hbm [shape: f32[1,1,1024], index: 4, kind: output, shape index: {}]  }
   0x1   :  { %10 = vsyncpa [#allocation6], 0 }
   0x2   :  { %11 = vsyncpa [#allocation9], 0  ;;  %s29_s17 = sshll.u32 %s310_s1, 4  ;;  %s30_s17 = int_to_ptr.hbm [resolvable:$true] %s29_s17 }
   0x3   :  { %12 = vsyncpa [#allocation4], 0  ;;  %s264_s18 = smov [#allocation5]   ;;  %s18_s22 = sshll.u32 %s309_s0, 4  ;;  %s19_s22 = int_to_ptr.hbm [resolvable:$true] %s18_s22 }
   0x4   :  { %s31_s19 = sshll.u32 %s264_s18, 4  ;;  %s265_s23 = smov [#allocation2]   ;;  %s32_s19 = int_to_ptr.vmem [resolvable:$true] %s31_s19 }
   0x5   :  { %34 = dma.hbm_to_vmem [thread:$0]  %s30_s17, 128, %s32_s19, [#allocation6]  }
   0x6   :  { %s20_s24 = sshll.u32 %s265_s23, 4  ;;  %s40_s27 = sshll.u32 %s311_s2, 4  ;;  %s21_s24 = int_to_ptr.vmem [resolvable:$true] %s20_s24  ;;  %s41_s27 = int_to_ptr.hbm [resolvable:$true] %s40_s27 }
   0x7   :  { %23 = dma.hbm_to_vmem [thread:$0]  %s19_s22, 128, %s21_s24, [#allocation3]  }
   0x8   :  { %s51_s29 = sshll.u32 %s312_s3, 4  ;;  %s266_s30 = smov [#allocation7]   ;;  %s52_s29 = int_to_ptr.hbm [resolvable:$true] %s51_s29 }
   0x9   :  { %s42_s5 = sshll.u32 %s266_s30, 4  ;;  %s267_s0 = smov [#allocation8]   ;;  %s43_s5 = int_to_ptr.vmem [resolvable:$true] %s42_s5 }
   0xa   :  { %45 = dma.hbm_to_vmem [thread:$0]  %s41_s27, 128, %s43_s5, [#allocation6]  }
   0xb   :  { %s53_s6 = sshll.u32 %s267_s0, 4  ;;  %s54_s6 = int_to_ptr.vmem [resolvable:$true] %s53_s6 }
   0xc   :  { %56 = dma.hbm_to_vmem [thread:$0]  %s52_s29, 128, %s54_s6, [#allocation9]  }
   0xd   :  { %256 = dma.done.wait [#allocation3], 128  }
   0xe   :  { %257 = vsyncadd [#allocation3], 4294967168 }
   0xf   :  { %258 = dma.done.wait [#allocation6], 256  }
  0x10   :  { %259 = vsyncadd [#allocation6], 4294967040 }
  0x11   :  { %260 = dma.done.wait [#allocation9], 128  }
  0x12   :  { %261 = vsyncadd [#allocation9], 4294967168  ;;  %v73_v0 = vld [vmem:[#allocation2] sm:$0xff]  ;;  %v87_v1 = vld [vmem:[#allocation5] sm:$0xff]  ;;  %s268_s2 = smov [#allocation10]   ;;  %s111_s9 = sshll.u32 %s313_s4, 4  ;;  %s112_s9 = int_to_ptr.hbm [resolvable:$true] %s111_s9 }
  0x13   :  { %128 = vlog2.f32 %v73_v0  ;;  %v78_v2 = vsub.f32 1.0, %v73_v0  ;;  %v92_v3 = vsub.f32 1.0, %v87_v1  ;;  %v74_v5 = vld [vmem:[#allocation7] sm:$0xff]  ;;  %v88_v8 = vld [vmem:[#allocation8] sm:$0xff]  ;;  %s109_s3 = sshll.u32 %s268_s2, 4  ;;  %s110_s3 = int_to_ptr.vmem [resolvable:$true] %s109_s3 }
  0x14   :  { %130 = vlog2.f32 %v87_v1  ;;  %v83_v14 = vsub.f32 1.0, %v74_v5  ;;  %v97_v17 = vsub.f32 1.0, %v88_v8 }
  0x15   :  { %132 = vlog2.f32 %v78_v2 }
  0x16   :  { %134 = vlog2.f32 %v92_v3 }
  0x19   :  { %v129_v4 = vpop.eup %128 }
  0x1a   :  { %v131_v6 = vpop.eup %130  ;;  %v76_v7 = vmul.f32 0.6931472, %v129_v4 }
  0x1b   :  { %v133_v9 = vpop.eup %132  ;;  %v90_v10 = vmul.f32 0.6931472, %v131_v6 }
  0x1c   :  { %v135_v11 = vpop.eup %134  ;;  %v77_v12 = vmax.f32 %v76_v7, -100.0  ;;  %v80_v13 = vmul.f32 0.6931472, %v133_v9 }
  0x1d   :  { %v91_v15 = vmax.f32 %v90_v10, -100.0  ;;  %v94_v16 = vmul.f32 0.6931472, %v135_v11 }
  0x1e   :  { %v81_v18 = vmax.f32 %v80_v13, -100.0  ;;  %v82_v19 = vmul.f32 %v77_v12, %v74_v5 }
  0x1f   :  { %v95_v20 = vmax.f32 %v94_v16, -100.0  ;;  %v96_v21 = vmul.f32 %v91_v15, %v88_v8 }
  0x20   :  { %v84_v22 = vmul.f32 %v83_v14, %v81_v18 }
  0x21   :  { %v98_v23 = vmul.f32 %v97_v17, %v95_v20 }
  0x22   :  { %v85_v24 = vadd.f32 %v84_v22, %v82_v19 }
  0x23   :  { %v99_v25 = vadd.f32 %v98_v23, %v96_v21 }
  0x24   :  { %v86_v26 = vsub.f32 0.0, %v85_v24 }
  0x25   :  { %v100_v27 = vsub.f32 0.0, %v99_v25 }
  0x27   :  { %v101_v28 = vadd.f32 %v100_v27, %v86_v26 }
  0x29   :  { %103 = vst [vmem:[#allocation10] sm:$0xff] %v101_v28 }
  0x2a   :  { %114 = dma.vmem_to_hbm [thread:$0]  %s110_s3, 128, %s112_s9, [#allocation4]  }
  0x2b   :  { %262 = dma.done.wait [#allocation4], 128  }
  0x2c   :  { %263 = vsyncadd [#allocation4], 4294967168 }
  0x2d   :  { %119 = vsyncpa [#allocation3], 1 }
  0x2e   :  { %120 = vsyncpa [#allocation6], 1 }
  0x2f   :  { %121 = vsyncpa [#allocation9], 1 }
  0x30   :  { %122 = vsyncpa [#allocation4], 1 }

</bundles_post_ra>
